<compile_context>
chip_gen: v7x
topology: tpu7x:2x2x1
jax: 0.10.0
libtpu: 0.0.40
codegen_flags: <defaults>
</compile_context>

<pallas_src>
import jax
import jax.numpy as jnp
from jax import lax
from jax.experimental import pallas as pl
from jax.experimental.pallas import tpu as pltpu


def block_kernel(x_ref, b0_ref, b1_ref, b2_ref, s1_ref, a1_ref,
                 d0_ref, d1_ref, d2_ref, sd_ref, ad_ref,
                 p_ref, sp_ref, ap_ref,
                 out_ref, xpad_ref, ypad_ref):
    """One batch element per grid step, everything in lane-dense (rows, W*C) layout.

    x_ref   : (1, H, W*CIN)      second channel-half of the input, (W,CIN) flattened to lanes
    b*_ref  : (W*CIN, W*MID)     3x3 conv as banded matmul, one matrix per kh tap
    d*_ref  : (W*MID, W*MID)     depthwise 3x3 as banded per-channel-diagonal matmul
    p_ref   : (W*MID, W*COUT)    1x1 pointwise conv as block-diagonal matmul
    s*/a*   : (1, W*C)           folded BatchNorm scale / bias, tiled over W
    out_ref : (1, H, W*COUT)     residual-branch output (shortcut concat happens in wrapper)
    xpad_ref: VMEM (H+2, W*CIN)  row-halo scratch for the input (border rows zero)
    ypad_ref: VMEM (H+2, W*MID)  row-halo scratch for the stage-1 output (border rows zero)
    """
    H = out_ref.shape[1]
    wcin = xpad_ref.shape[1]
    wmid = ypad_ref.shape[1]
    f32 = jnp.float32

    # Only the two border rows need to be zero (interior rows are fully overwritten).
    # Re-zero them every step (cheap, lane-dense) so correctness holds even when the
    # batch grid is split across TensorCores (each core has its own scratch).
    zx = jnp.zeros((1, wcin), f32)
    zy = jnp.zeros((1, wmid), f32)
    xpad_ref[0:1, :] = zx
    xpad_ref[H + 1:H + 2, :] = zx
    ypad_ref[0:1, :] = zy
    ypad_ref[H + 1:H + 2, :] = zy

    # Stage the input rows into the halo scratch (full-width, lane-dense store).
    xpad_ref[1:H + 1, :] = x_ref[0]

    # ---- stage 1: 3x3 conv (three banded matmuls over the row halo) + BN + ReLU ----
    y = (jnp.dot(xpad_ref[0:H, :], b0_ref[...], preferred_element_type=f32)
         + jnp.dot(xpad_ref[1:H + 1, :], b1_ref[...], preferred_element_type=f32)
         + jnp.dot(xpad_ref[2:H + 2, :], b2_ref[...], preferred_element_type=f32))
    y = jnp.maximum(y * s1_ref[...] + a1_ref[...], 0.0)          # (H, W*MID), lane-dense

    ypad_ref[1:H + 1, :] = y

    # ---- stage 2: depthwise 3x3 (three banded matmuls) + BN (no ReLU) ----
    z = (jnp.dot(ypad_ref[0:H, :], d0_ref[...], preferred_element_type=f32)
         + jnp.dot(ypad_ref[1:H + 1, :], d1_ref[...], preferred_element_type=f32)
         + jnp.dot(ypad_ref[2:H + 2, :], d2_ref[...], preferred_element_type=f32))
    z = z * sd_ref[...] + ad_ref[...]                             # (H, W*MID)

    # ---- stage 3: 1x1 pointwise conv + BN (no ReLU) ----
    o = jnp.dot(z, p_ref[...], preferred_element_type=f32)        # (H, W*COUT)
    out_ref[0] = (o * sp_ref[...] + ap_ref[...]).astype(out_ref.dtype)


def build_kernel_operands(p, W):
    """Precompute banded matmul matrices + BN vectors for the flattened (W*C) layout."""
    w1, wd, wp = p['w1'], p['wd'], p['wp']        # (3,3,CIN,MID), (3,3,MID), (MID,COUT)
    CIN, MID = w1.shape[2], w1.shape[3]
    COUT = wp.shape[1]

    def shift(dw):
        # S[w_in, w_out] = 1 iff w_in == w_out + dw; zeros outside -> W-boundary padding
        # is folded directly into the band structure.
        return jnp.eye(W, k=-dw, dtype=jnp.float32)

    B, D = [], []
    for kh in range(3):
        b = sum(jnp.einsum('pw,cm->pcwm', shift(kw - 1), w1[kh, kw]) for kw in range(3))
        B.append(b.reshape(W * CIN, W * MID))
        d = sum(jnp.einsum('pw,nm->pnwm', shift(kw - 1), jnp.diag(wd[kh, kw]))
                for kw in range(3))
        D.append(d.reshape(W * MID, W * MID))
    P = jnp.einsum('pw,mo->pmwo', jnp.eye(W, dtype=jnp.float32), wp).reshape(W * MID, W * COUT)

    def tile_bn(v):                               # (1, C) -> (1, W*C), index w*C + c
        return jnp.tile(v.reshape(-1), W).reshape(1, -1)

    return dict(B=B, D=D, P=P,
                s1=tile_bn(p['s1']), a1=tile_bn(p['b1']),
                sd=tile_bn(p['sd']), ad=tile_bn(p['bd']),
                sp=tile_bn(p['sp']), ap=tile_bn(p['bp']))


def block_forward(x_nchw, p):
    """stride=1 Block forward (NCHW in / NCHW out) using the Pallas kernel."""
    N, C, H, W = x_nchw.shape
    half = C // 2
    MID = p['w1'].shape[3]
    COUT = p['wp'].shape[1]

    x_nhwc = jnp.transpose(x_nchw, (0, 2, 3, 1))
    shortcut = x_nhwc[..., :half]                      # passthrough: never enters the kernel
    xin = x_nhwc[..., half:].reshape(N, H, W * half)   # lane-dense (W, CIN) -> lanes

    ops = build_kernel_operands(p, W)
    wcin, wmid, wcout = W * half, W * MID, W * COUT

    o_flat = pl.pallas_call(
        block_kernel,
        out_shape=jax.ShapeDtypeStruct((N, H, wcout), jnp.float32),
        grid_spec=pltpu.PrefetchScalarGridSpec(
            num_scalar_prefetch=0,
            grid=(N,),
            in_specs=[
                pl.BlockSpec((1, H, wcin), lambda n: (n, 0, 0)),
                pl.BlockSpec((wcin, wmid), lambda n: (0, 0)),
                pl.BlockSpec((wcin, wmid), lambda n: (0, 0)),
                pl.BlockSpec((wcin, wmid), lambda n: (0, 0)),
                pl.BlockSpec((1, wmid), lambda n: (0, 0)),
                pl.BlockSpec((1, wmid), lambda n: (0, 0)),
                pl.BlockSpec((wmid, wmid), lambda n: (0, 0)),
                pl.BlockSpec((wmid, wmid), lambda n: (0, 0)),
                pl.BlockSpec((wmid, wmid), lambda n: (0, 0)),
                pl.BlockSpec((1, wmid), lambda n: (0, 0)),
                pl.BlockSpec((1, wmid), lambda n: (0, 0)),
                pl.BlockSpec((wmid, wcout), lambda n: (0, 0)),
                pl.BlockSpec((1, wcout), lambda n: (0, 0)),
                pl.BlockSpec((1, wcout), lambda n: (0, 0)),
            ],
            out_specs=pl.BlockSpec((1, H, wcout), lambda n: (n, 0, 0)),
            scratch_shapes=[pltpu.VMEM((H + 2, wcin), jnp.float32),
                            pltpu.VMEM((H + 2, wmid), jnp.float32)],
        ),
        compiler_params=pltpu.CompilerParams(
            dimension_semantics=("parallel",)),
    )(xin, ops['B'][0], ops['B'][1], ops['B'][2], ops['s1'], ops['a1'],
      ops['D'][0], ops['D'][1], ops['D'][2], ops['sd'], ops['ad'],
      ops['P'], ops['sp'], ops['ap'])

    o_nhwc = o_flat.reshape(N, H, W, COUT)
    # torch.cat([residual_branch(x), shortcut], dim=1): branch channels first.
    out_nhwc = jnp.concatenate([o_nhwc, shortcut], axis=-1)
    return jnp.transpose(out_nhwc, (0, 3, 1, 2))


def make_params(key, cin_half, expansion):
    """Deterministic synthetic parameters (PyTorch layouts, then converted)."""
    mid = int(round(cin_half * expansion))
    cout = cin_half
    ks = jax.random.split(key, 6)
    w1_oihw = 0.2 * jax.random.normal(ks[0], (mid, cin_half, 3, 3), jnp.float32)
    wd_oihw = 0.2 * jax.random.normal(ks[1], (mid, 1, 3, 3), jnp.float32)
    wp_oihw = 0.2 * jax.random.normal(ks[2], (cout, mid, 1, 1), jnp.float32)

    def fold_bn(k, c):
        kg, kb, km, kv = jax.random.split(k, 4)
        gamma = 1.0 + 0.1 * jax.random.normal(kg, (c,), jnp.float32)
        beta = 0.1 * jax.random.normal(kb, (c,), jnp.float32)
        mean = 0.1 * jax.random.normal(km, (c,), jnp.float32)
        var = 0.5 + jnp.abs(jax.random.normal(kv, (c,), jnp.float32))
        s = gamma / jnp.sqrt(var + 1e-5)
        b = beta - mean * s
        return s.reshape(1, c), b.reshape(1, c)

    s1, b1 = fold_bn(ks[3], mid)
    sd, bd = fold_bn(ks[4], mid)
    sp, bp = fold_bn(ks[5], cout)

    return dict(
        w1=jnp.transpose(w1_oihw, (2, 3, 1, 0)),      # (3,3,cin,mid)  HWIO
        wd=jnp.transpose(wd_oihw[:, 0], (1, 2, 0)),   # (3,3,mid)
        wp=wp_oihw[:, :, 0, 0].T,                     # (mid,cout)
        s1=s1, b1=b1, sd=sd, bd=bd, sp=sp, bp=bp,
    )


def reference_forward(x_nhwc, p):
    """Pure-JAX reference (lax.conv) for correctness check."""
    half = x_nhwc.shape[-1] // 2
    shortcut, xin = x_nhwc[..., :half], x_nhwc[..., half:]
    dn = ('NHWC', 'HWIO', 'NHWC')
    mid = p['w1'].shape[-1]
    y = lax.conv_general_dilated(xin, p['w1'], (1, 1), ((1, 1), (1, 1)),
                                 dimension_numbers=dn)
    y = jnp.maximum(y * p['s1'] + p['b1'], 0.0)
    z = lax.conv_general_dilated(y, p['wd'].reshape(3, 3, 1, mid), (1, 1),
                                 ((1, 1), (1, 1)), dimension_numbers=dn,
                                 feature_group_count=mid)
    z = z * p['sd'] + p['bd']
    o = lax.conv_general_dilated(z, p['wp'][None, None], (1, 1),
                                 ((0, 0), (0, 0)), dimension_numbers=dn)
    o = o * p['sp'] + p['bp']
    return jnp.concatenate([o, shortcut], axis=-1)


if __name__ == "__main__":
    key = jax.random.PRNGKey(0)
    kx, kp = jax.random.split(key)

    # PyTorch-style input: NCHW, stride=1 block => in_channels == out_channels
    N, C, H, W = 2, 8, 16, 16
    expansion = 2
    x_nchw = jax.random.normal(kx, (N, C, H, W), jnp.float32)
    params = make_params(kp, C // 2, expansion)

    out_nchw = block_forward(x_nchw, params)
    jax.block_until_ready(out_nchw)

    x_nhwc = jnp.transpose(x_nchw, (0, 2, 3, 1))
    ref_nchw = jnp.transpose(reference_forward(x_nhwc, params), (0, 3, 1, 2))
    assert out_nchw.shape == (N, C, H, W), out_nchw.shape
    err = float(jnp.max(jnp.abs(out_nchw - ref_nchw)))
    if err < 1e-3:
        print("KERNEL_OK")
    else:
        raise SystemExit(f"mismatch vs reference: max abs err = {err}")
</pallas_src>

<mosaic_0001>
module attributes {stable_mosaic.version = 11 : i64} {
  func.func @block_kernel(%arg0: i32, %arg1: memref<1x16x64xf32, #tpu.memory_space<vmem>>, %arg2: memref<64x128xf32, #tpu.memory_space<vmem>>, %arg3: memref<64x128xf32, #tpu.memory_space<vmem>>, %arg4: memref<64x128xf32, #tpu.memory_space<vmem>>, %arg5: memref<1x128xf32, #tpu.memory_space<vmem>>, %arg6: memref<1x128xf32, #tpu.memory_space<vmem>>, %arg7: memref<128x128xf32, #tpu.memory_space<vmem>>, %arg8: memref<128x128xf32, #tpu.memory_space<vmem>>, %arg9: memref<128x128xf32, #tpu.memory_space<vmem>>, %arg10: memref<1x128xf32, #tpu.memory_space<vmem>>, %arg11: memref<1x128xf32, #tpu.memory_space<vmem>>, %arg12: memref<128x64xf32, #tpu.memory_space<vmem>>, %arg13: memref<1x64xf32, #tpu.memory_space<vmem>>, %arg14: memref<1x64xf32, #tpu.memory_space<vmem>>, %arg15: memref<1x16x64xf32, #tpu.memory_space<vmem>>, %arg16: memref<18x64xf32, #tpu.memory_space<vmem>>, %arg17: memref<18x128xf32, #tpu.memory_space<vmem>>) attributes {dimension_semantics = [#tpu.dimension_semantics<parallel>], iteration_bounds = array<i64: 2>, scalar_prefetch = 0 : i64, scratch_operands = 2 : i64, tpu.core_type = #tpu.core_type<tc>, window_params = [{transform_indices = @transform_0, window_bounds = array<i64: 1, 16, 64>}, {pipeline_mode = #tpu.pipeline_mode<synchronous>, transform_indices = @transform_1, window_bounds = array<i64: 64, 128>}, {pipeline_mode = #tpu.pipeline_mode<synchronous>, transform_indices = @transform_2, window_bounds = array<i64: 64, 128>}, {pipeline_mode = #tpu.pipeline_mode<synchronous>, transform_indices = @transform_3, window_bounds = array<i64: 64, 128>}, {pipeline_mode = #tpu.pipeline_mode<synchronous>, transform_indices = @transform_4, window_bounds = array<i64: 1, 128>}, {pipeline_mode = #tpu.pipeline_mode<synchronous>, transform_indices = @transform_5, window_bounds = array<i64: 1, 128>}, {pipeline_mode = #tpu.pipeline_mode<synchronous>, transform_indices = @transform_6, window_bounds = array<i64: 128, 128>}, {pipeline_mode = #tpu.pipeline_mode<synchronous>, transform_indices = @transform_7, window_bounds = array<i64: 128, 128>}, {pipeline_mode = #tpu.pipeline_mode<synchronous>, transform_indices = @transform_8, window_bounds = array<i64: 128, 128>}, {pipeline_mode = #tpu.pipeline_mode<synchronous>, transform_indices = @transform_9, window_bounds = array<i64: 1, 128>}, {pipeline_mode = #tpu.pipeline_mode<synchronous>, transform_indices = @transform_10, window_bounds = array<i64: 1, 128>}, {pipeline_mode = #tpu.pipeline_mode<synchronous>, transform_indices = @transform_11, window_bounds = array<i64: 128, 64>}, {pipeline_mode = #tpu.pipeline_mode<synchronous>, transform_indices = @transform_12, window_bounds = array<i64: 1, 64>}, {pipeline_mode = #tpu.pipeline_mode<synchronous>, transform_indices = @transform_13, window_bounds = array<i64: 1, 64>}, {transform_indices = @transform_14, window_bounds = array<i64: 1, 16, 64>}]} {
    %cst = arith.constant 0.000000e+00 : f32
    %0 = vector.broadcast %cst : f32 to vector<1x64xf32>
    %cst_0 = arith.constant 0.000000e+00 : f32
    %1 = vector.broadcast %cst_0 : f32 to vector<1x128xf32>
    %c0 = arith.constant 0 : index
    %c0_1 = arith.constant 0 : index
    %2 = vector.load %arg16[%c0, %c0_1] : memref<18x64xf32, #tpu.memory_space<vmem>>, vector<1x64xf32>
    tpu.vector_store %arg16[%c0, %c0_1], %0 {strides = array<i32>} : memref<18x64xf32, #tpu.memory_space<vmem>>, vector<1x64xf32>,
    %c17 = arith.constant 17 : index
    %c0_2 = arith.constant 0 : index
    %3 = vector.load %arg16[%c17, %c0_2] : memref<18x64xf32, #tpu.memory_space<vmem>>, vector<1x64xf32>
    tpu.vector_store %arg16[%c17, %c0_2], %0 {strides = array<i32>} : memref<18x64xf32, #tpu.memory_space<vmem>>, vector<1x64xf32>,
    %c0_3 = arith.constant 0 : index
    %c0_4 = arith.constant 0 : index
    %4 = vector.load %arg17[%c0_3, %c0_4] : memref<18x128xf32, #tpu.memory_space<vmem>>, vector<1x128xf32>
    tpu.vector_store %arg17[%c0_3, %c0_4], %1 {strides = array<i32>} : memref<18x128xf32, #tpu.memory_space<vmem>>, vector<1x128xf32>,
    %c17_5 = arith.constant 17 : index
    %c0_6 = arith.constant 0 : index
    %5 = vector.load %arg17[%c17_5, %c0_6] : memref<18x128xf32, #tpu.memory_space<vmem>>, vector<1x128xf32>
    tpu.vector_store %arg17[%c17_5, %c0_6], %1 {strides = array<i32>} : memref<18x128xf32, #tpu.memory_space<vmem>>, vector<1x128xf32>,
    %c0_7 = arith.constant 0 : index
    %c0_8 = arith.constant 0 : index
    %c0_9 = arith.constant 0 : index
    %6 = vector.load %arg1[%c0_7, %c0_8, %c0_9] : memref<1x16x64xf32, #tpu.memory_space<vmem>>, vector<1x16x64xf32>
    %7 = vector.shape_cast %6 : vector<1x16x64xf32> to vector<16x64xf32>
    %c1 = arith.constant 1 : index
    %c0_10 = arith.constant 0 : index
    %8 = vector.load %arg16[%c1, %c0_10] : memref<18x64xf32, #tpu.memory_space<vmem>>, vector<16x64xf32>
    tpu.vector_store %arg16[%c1, %c0_10], %7 {strides = array<i32>} : memref<18x64xf32, #tpu.memory_space<vmem>>, vector<16x64xf32>,
    %c0_11 = arith.constant 0 : index
    %c0_12 = arith.constant 0 : index
    %9 = vector.load %arg16[%c0_11, %c0_12] : memref<18x64xf32, #tpu.memory_space<vmem>>, vector<16x64xf32>
    %c0_13 = arith.constant 0 : index
    %c0_14 = arith.constant 0 : index
    %10 = vector.load %arg2[%c0_13, %c0_14] : memref<64x128xf32, #tpu.memory_space<vmem>>, vector<64x128xf32>
    %cst_15 = arith.constant dense<0.000000e+00> : vector<16x128xf32>
    %11 = tpu.matmul %9, %10, %cst_15 {dimension_numbers = #tpu.dot_dimension_numbers<[1], [0], [0], [1], [0, 0, 1, 1], [], []>} : vector<16x64xf32>, vector<64x128xf32>, vector<16x128xf32> -> vector<16x128xf32>
    %c1_16 = arith.constant 1 : index
    %c0_17 = arith.constant 0 : index
    %12 = vector.load %arg16[%c1_16, %c0_17] : memref<18x64xf32, #tpu.memory_space<vmem>>, vector<16x64xf32>
    %c0_18 = arith.constant 0 : index
    %c0_19 = arith.constant 0 : index
    %13 = vector.load %arg3[%c0_18, %c0_19] : memref<64x128xf32, #tpu.memory_space<vmem>>, vector<64x128xf32>
    %cst_20 = arith.constant dense<0.000000e+00> : vector<16x128xf32>
    %14 = tpu.matmul %12, %13, %cst_20 {dimension_numbers = #tpu.dot_dimension_numbers<[1], [0], [0], [1], [0, 0, 1, 1], [], []>} : vector<16x64xf32>, vector<64x128xf32>, vector<16x128xf32> -> vector<16x128xf32>
    %15 = arith.addf %11, %14 : vector<16x128xf32>
    %c2 = arith.constant 2 : index
    %c0_21 = arith.constant 0 : index
    %16 = vector.load %arg16[%c2, %c0_21] : memref<18x64xf32, #tpu.memory_space<vmem>>, vector<16x64xf32>
    %c0_22 = arith.constant 0 : index
    %c0_23 = arith.constant 0 : index
    %17 = vector.load %arg4[%c0_22, %c0_23] : memref<64x128xf32, #tpu.memory_space<vmem>>, vector<64x128xf32>
    %cst_24 = arith.constant dense<0.000000e+00> : vector<16x128xf32>
    %18 = tpu.matmul %16, %17, %cst_24 {dimension_numbers = #tpu.dot_dimension_numbers<[1], [0], [0], [1], [0, 0, 1, 1], [], []>} : vector<16x64xf32>, vector<64x128xf32>, vector<16x128xf32> -> vector<16x128xf32>
    %19 = arith.addf %15, %18 : vector<16x128xf32>
    %c0_25 = arith.constant 0 : index
    %c0_26 = arith.constant 0 : index
    %20 = vector.load %arg5[%c0_25, %c0_26] : memref<1x128xf32, #tpu.memory_space<vmem>>, vector<1x128xf32>
    %21 = vector.broadcast %20 : vector<1x128xf32> to vector<16x128xf32>
    %22 = arith.mulf %19, %21 : vector<16x128xf32>
    %c0_27 = arith.constant 0 : index
    %c0_28 = arith.constant 0 : index
    %23 = vector.load %arg6[%c0_27, %c0_28] : memref<1x128xf32, #tpu.memory_space<vmem>>, vector<1x128xf32>
    %24 = vector.broadcast %23 : vector<1x128xf32> to vector<16x128xf32>
    %25 = arith.addf %22, %24 : vector<16x128xf32>
    %cst_29 = arith.constant 0.000000e+00 : f32
    %26 = vector.broadcast %cst_29 : f32 to vector<16x128xf32>
    %27 = arith.maximumf %25, %26 : vector<16x128xf32>
    %c1_30 = arith.constant 1 : index
    %c0_31 = arith.constant 0 : index
    %28 = vector.load %arg17[%c1_30, %c0_31] : memref<18x128xf32, #tpu.memory_space<vmem>>, vector<16x128xf32>
    tpu.vector_store %arg17[%c1_30, %c0_31], %27 {strides = array<i32>} : memref<18x128xf32, #tpu.memory_space<vmem>>, vector<16x128xf32>,
    %c0_32 = arith.constant 0 : index
    %c0_33 = arith.constant 0 : index
    %29 = vector.load %arg17[%c0_32, %c0_33] : memref<18x128xf32, #tpu.memory_space<vmem>>, vector<16x128xf32>
    %c0_34 = arith.constant 0 : index
    %c0_35 = arith.constant 0 : index
    %30 = vector.load %arg7[%c0_34, %c0_35] : memref<128x128xf32, #tpu.memory_space<vmem>>, vector<128x128xf32>
    %cst_36 = arith.constant dense<0.000000e+00> : vector<16x128xf32>
    %31 = tpu.matmul %29, %30, %cst_36 {dimension_numbers = #tpu.dot_dimension_numbers<[1], [0], [0], [1], [0, 0, 1, 1], [], []>} : vector<16x128xf32>, vector<128x128xf32>, vector<16x128xf32> -> vector<16x128xf32>
    %c1_37 = arith.constant 1 : index
    %c0_38 = arith.constant 0 : index
    %32 = vector.load %arg17[%c1_37, %c0_38] : memref<18x128xf32, #tpu.memory_space<vmem>>, vector<16x128xf32>
    %c0_39 = arith.constant 0 : index
    %c0_40 = arith.constant 0 : index
    %33 = vector.load %arg8[%c0_39, %c0_40] : memref<128x128xf32, #tpu.memory_space<vmem>>, vector<128x128xf32>
    %cst_41 = arith.constant dense<0.000000e+00> : vector<16x128xf32>
    %34 = tpu.matmul %32, %33, %cst_41 {dimension_numbers = #tpu.dot_dimension_numbers<[1], [0], [0], [1], [0, 0, 1, 1], [], []>} : vector<16x128xf32>, vector<128x128xf32>, vector<16x128xf32> -> vector<16x128xf32>
    %35 = arith.addf %31, %34 : vector<16x128xf32>
    %c2_42 = arith.constant 2 : index
    %c0_43 = arith.constant 0 : index
    %36 = vector.load %arg17[%c2_42, %c0_43] : memref<18x128xf32, #tpu.memory_space<vmem>>, vector<16x128xf32>
    %c0_44 = arith.constant 0 : index
    %c0_45 = arith.constant 0 : index
    %37 = vector.load %arg9[%c0_44, %c0_45] : memref<128x128xf32, #tpu.memory_space<vmem>>, vector<128x128xf32>
    %cst_46 = arith.constant dense<0.000000e+00> : vector<16x128xf32>
    %38 = tpu.matmul %36, %37, %cst_46 {dimension_numbers = #tpu.dot_dimension_numbers<[1], [0], [0], [1], [0, 0, 1, 1], [], []>} : vector<16x128xf32>, vector<128x128xf32>, vector<16x128xf32> -> vector<16x128xf32>
    %39 = arith.addf %35, %38 : vector<16x128xf32>
    %c0_47 = arith.constant 0 : index
    %c0_48 = arith.constant 0 : index
    %40 = vector.load %arg10[%c0_47, %c0_48] : memref<1x128xf32, #tpu.memory_space<vmem>>, vector<1x128xf32>
    %41 = vector.broadcast %40 : vector<1x128xf32> to vector<16x128xf32>
    %42 = arith.mulf %39, %41 : vector<16x128xf32>
    %c0_49 = arith.constant 0 : index
    %c0_50 = arith.constant 0 : index
    %43 = vector.load %arg11[%c0_49, %c0_50] : memref<1x128xf32, #tpu.memory_space<vmem>>, vector<1x128xf32>
    %44 = vector.broadcast %43 : vector<1x128xf32> to vector<16x128xf32>
    %45 = arith.addf %42, %44 : vector<16x128xf32>
    %c0_51 = arith.constant 0 : index
    %c0_52 = arith.constant 0 : index
    %46 = vector.load %arg12[%c0_51, %c0_52] : memref<128x64xf32, #tpu.memory_space<vmem>>, vector<128x64xf32>
    %cst_53 = arith.constant dense<0.000000e+00> : vector<16x64xf32>
    %47 = tpu.matmul %45, %46, %cst_53 {dimension_numbers = #tpu.dot_dimension_numbers<[1], [0], [0], [1], [0, 0, 1, 1], [], []>} : vector<16x128xf32>, vector<128x64xf32>, vector<16x64xf32> -> vector<16x64xf32>
    %c0_54 = arith.constant 0 : index
    %c0_55 = arith.constant 0 : index
    %48 = vector.load %arg13[%c0_54, %c0_55] : memref<1x64xf32, #tpu.memory_space<vmem>>, vector<1x64xf32>
    %49 = vector.broadcast %48 : vector<1x64xf32> to vector<16x64xf32>
    %50 = arith.mulf %47, %49 : vector<16x64xf32>
    %c0_56 = arith.constant 0 : index
    %c0_57 = arith.constant 0 : index
    %51 = vector.load %arg14[%c0_56, %c0_57] : memref<1x64xf32, #tpu.memory_space<vmem>>, vector<1x64xf32>
    %52 = vector.broadcast %51 : vector<1x64xf32> to vector<16x64xf32>
    %53 = arith.addf %50, %52 : vector<16x64xf32>
    %c0_58 = arith.constant 0 : index
    %c0_59 = arith.constant 0 : index
    %c0_60 = arith.constant 0 : index
    %54 = vector.load %arg15[%c0_58, %c0_59, %c0_60] : memref<1x16x64xf32, #tpu.memory_space<vmem>>, vector<1x16x64xf32>
    %55 = vector.shape_cast %54 : vector<1x16x64xf32> to vector<16x64xf32>
    %56 = vector.shape_cast %53 : vector<16x64xf32> to vector<1x16x64xf32>
    tpu.vector_store %arg15[%c0_58, %c0_59, %c0_60], %56 {strides = array<i32>} : memref<1x16x64xf32, #tpu.memory_space<vmem>>, vector<1x16x64xf32>,
    return
  }
  func.func @transform_0(%arg0: i32) -> (i32, i32, i32) {
    %c0_i32 = arith.constant 0 : i32
    %c0_i32_0 = arith.constant 0 : i32
    %c0_i32_1 = arith.constant 0 : i32
    return %arg0, %c0_i32, %c0_i32_0 : i32, i32, i32
  }
  func.func @transform_1(%arg0: i32) -> (i32, i32) {
    %c0_i32 = arith.constant 0 : i32
    %c0_i32_0 = arith.constant 0 : i32
    %c0_i32_1 = arith.constant 0 : i32
    return %c0_i32, %c0_i32_0 : i32, i32
  }
  func.func @transform_2(%arg0: i32) -> (i32, i32) {
    %c0_i32 = arith.constant 0 : i32
    %c0_i32_0 = arith.constant 0 : i32
    %c0_i32_1 = arith.constant 0 : i32
    return %c0_i32, %c0_i32_0 : i32, i32
  }
  func.func @transform_3(%arg0: i32) -> (i32, i32) {
    %c0_i32 = arith.constant 0 : i32
    %c0_i32_0 = arith.constant 0 : i32
    %c0_i32_1 = arith.constant 0 : i32
    return %c0_i32, %c0_i32_0 : i32, i32
  }
  func.func @transform_4(%arg0: i32) -> (i32, i32) {
    %c0_i32 = arith.constant 0 : i32
    %c0_i32_0 = arith.constant 0 : i32
    %c0_i32_1 = arith.constant 0 : i32
    return %c0_i32, %c0_i32_0 : i32, i32
  }
  func.func @transform_5(%arg0: i32) -> (i32, i32) {
    %c0_i32 = arith.constant 0 : i32
    %c0_i32_0 = arith.constant 0 : i32
    %c0_i32_1 = arith.constant 0 : i32
    return %c0_i32, %c0_i32_0 : i32, i32
  }
  func.func @transform_6(%arg0: i32) -> (i32, i32) {
    %c0_i32 = arith.constant 0 : i32
    %c0_i32_0 = arith.constant 0 : i32
    %c0_i32_1 = arith.constant 0 : i32
    return %c0_i32, %c0_i32_0 : i32, i32
  }
  func.func @transform_7(%arg0: i32) -> (i32, i32) {
    %c0_i32 = arith.constant 0 : i32
    %c0_i32_0 = arith.constant 0 : i32
    %c0_i32_1 = arith.constant 0 : i32
    return %c0_i32, %c0_i32_0 : i32, i32
  }
  func.func @transform_8(%arg0: i32) -> (i32, i32) {
    %c0_i32 = arith.constant 0 : i32
    %c0_i32_0 = arith.constant 0 : i32
    %c0_i32_1 = arith.constant 0 : i32
    return %c0_i32, %c0_i32_0 : i32, i32
  }
  func.func @transform_9(%arg0: i32) -> (i32, i32) {
    %c0_i32 = arith.constant 0 : i32
    %c0_i32_0 = arith.constant 0 : i32
    %c0_i32_1 = arith.constant 0 : i32
    return %c0_i32, %c0_i32_0 : i32, i32
  }
  func.func @transform_10(%arg0: i32) -> (i32, i32) {
    %c0_i32 = arith.constant 0 : i32
    %c0_i32_0 = arith.constant 0 : i32
    %c0_i32_1 = arith.constant 0 : i32
    return %c0_i32, %c0_i32_0 : i32, i32
  }
  func.func @transform_11(%arg0: i32) -> (i32, i32) {
    %c0_i32 = arith.constant 0 : i32
    %c0_i32_0 = arith.constant 0 : i32
    %c0_i32_1 = arith.constant 0 : i32
    return %c0_i32, %c0_i32_0 : i32, i32
  }
  func.func @transform_12(%arg0: i32) -> (i32, i32) {
    %c0_i32 = arith.constant 0 : i32
    %c0_i32_0 = arith.constant 0 : i32
    %c0_i32_1 = arith.constant 0 : i32
    return %c0_i32, %c0_i32_0 : i32, i32
  }
  func.func @transform_13(%arg0: i32) -> (i32, i32) {
    %c0_i32 = arith.constant 0 : i32
    %c0_i32_0 = arith.constant 0 : i32
    %c0_i32_1 = arith.constant 0 : i32
    return %c0_i32, %c0_i32_0 : i32, i32
  }
  func.func @transform_14(%arg0: i32) -> (i32, i32, i32) {
    %c0_i32 = arith.constant 0 : i32
    %c0_i32_0 = arith.constant 0 : i32
    %c0_i32_1 = arith.constant 0 : i32
    return %arg0, %c0_i32, %c0_i32_0 : i32, i32, i32
  }
}

</mosaic_0001>

<bundles_post_ra>
// kernel: tpu_custom_call.1
= control target key start
LH: loop header
LB: loop body
LE: loop exit
PB: predicated region body
PF: predicated region fallthrough
CT: control target
= control target key end

     0   :  { %s2745_s0 = inlined_call_operand.hbm [shape: f32[2,16,64], index: 0, kind: input, shape index: {}]   ;;  %s2746_s1 = inlined_call_operand.vmem [shape: f32[64,128], index: 1, kind: input, shape index: {}]   ;;  %s2747_s2 = inlined_call_operand.hbm [shape: f32[64,128], index: 2, kind: input, shape index: {}]   ;;  %s2748_s3 = inlined_call_operand.hbm [shape: f32[64,128], index: 3, kind: input, shape index: {}]   ;;  %s2749_s4 = inlined_call_operand.vmem [shape: f32[1,128], index: 4, kind: input, shape index: {}]   ;;  %s2750_s5 = inlined_call_operand.vmem [shape: f32[1,128], index: 5, kind: input, shape index: {}]   ;;  %s2751_s6 = inlined_call_operand.vmem [shape: f32[128,128], index: 6, kind: input, shape index: {}]   ;;  %s2752_s7 = inlined_call_operand.hbm [shape: f32[128,128], index: 7, kind: input, shape index: {}]   ;;  %s2753_s8 = inlined_call_operand.hbm [shape: f32[128,128], index: 8, kind: input, shape index: {}]   ;;  %s2754_s9 = inlined_call_operand.vmem [shape: f32[1,128], index: 9, kind: input, shape index: {}]   ;;  %s2755_s10 = inlined_call_operand.vmem [shape: f32[1,128], index: 10, kind: input, shape index: {}]   ;;  %s2756_s11 = inlined_call_operand.vmem [shape: f32[128,64], index: 11, kind: input, shape index: {}]   ;;  %s2757_s12 = inlined_call_operand.vmem [shape: f32[1,64], index: 12, kind: input, shape index: {}]   ;;  %s2758_s13 = inlined_call_operand.vmem [shape: f32[1,64], index: 13, kind: input, shape index: {}]   ;;  %s2759_s14 = inlined_call_operand.hbm [shape: f32[2,16,64], index: 14, kind: output, shape index: {}]  }
   0x1   :  { %2766 = sst [smem:[#allocation20_spill]] %s2750_s5 }
   0x2   :  { %2767 = sst [smem:[#allocation21_spill]] %s2754_s9 }
   0x3   :  { %2768 = sst [smem:[#allocation22_spill]] %s2755_s10 }
   0x4   :  { %2769 = sst [smem:[#allocation23_spill]] %s2757_s12 }
   0x5   :  { %2770 = sst [smem:[#allocation24_spill]] %s2758_s13 }
   0x6   :  { %2771 = sst [smem:[#allocation25_spill]] %s2759_s14 }
   0x7   :  { %19 = vsyncpa [#allocation5], 0 }
   0x8   :  { %21 = vsyncpa [#allocation5 + $0x1], 0 }
   0x9   :  { %22 = vsyncpa [#allocation8], 0 }
   0xa   :  { %23 = vsyncpa [#allocation11], 0 }
   0xb   :  { %24 = vsyncpa [#allocation6], 0 }
   0xc   :  { %26 = vsyncpa [#allocation6 + $0x1], 0  ;;  %s2301_s29 = smov 0   ;;  %s2303_s30 = smov 0  }
   0xd   :  { %s2305_s15 = smov 0   ;;  %s2307_s16 = smov 0  }
   0xe LB: > { %2772 = sst [smem:[#allocation18_spill]] %s2201_s29  ;;  %s2322_s17 = sadd.s32 4294967295, %s2213_s16   ;;  %s2213_s16 = sphi %s2307_s16, %s2801_s16   ;;  %s2209_s15 = sphi %s2305_s15, %s2800_s15   ;;  %s2205_s30 = sphi %s2303_s30, %s2799_s30   ;;  %s2201_s29 = sphi %s2301_s29, %s2798_s29  }
   0xf   : > { %s1386_s18 = sadd.s32 4294967294, %s2213_s16   ;;  %p52_p0 = scmp.ne.s32.totalorder %s2205_s30, %s2201_s29 }
  0x10   : > { %p2763_p1 = scmp.eq.s32.totalorder %s2322_s17, 0  ;;  %p355_p3 = scmp.eq.s32.totalorder %s1386_s18, 1 }
  0x11   : > { %p1387_p5 = scmp.ge.s32.totalorder %s2213_s16, 1  ;;  %p362_p7 = scmp.lt.s32.totalorder %s2213_s16, 3 }
  0x12   : > { %p2331_p4 = por %p2763_p1, %p52_p0  ;;  %p2336_p6 = por %p355_p3, %p52_p0 }
  0x13   : > { %p2341_p8 = pnand %p1387_p5, %p362_p7  ;;  %s2215_s22 = smov [#allocation7]  }
  0x14   : > { %s2773_s19 = scalar_select %p2331_p4, 1, 0 }
  0x15   : > { %s2774_s20 = scalar_select %p2336_p6, 1, 0 }
  0x16   : > { %s2776_s21 = scalar_select %p2341_p8, 1, 0 }
  0x17   : > { %2775 = sst [smem:[#allocation19_spill]] %s2774_s20  ;;  %s377_s23 = sshll.u32 %s2215_s22, 4  ;;  %s2345_s23 = int_to_ptr.vmem [resolvable:$true] %s377_s23 }
  0x18   : > { %p1925_p9 = pneg %p2341_p8  ;;  %s2216_s25 = smov [#allocation10]  }
  0x19   : > { %s412_s26 = sshll.u32 %s2216_s25, 4  ;;  %s2217_s27 = smov [#allocation9]   ;;  %s2356_s26 = int_to_ptr.vmem [resolvable:$true] %s412_s26 }
  0x1a   : > { %p2352_p11 = pnand %p1925_p9, %p2763_p1  ;;  %s2358_s28 = sshll.u32 %s2217_s27, 4  ;;  %s391_s28 = int_to_ptr.vmem [resolvable:$true] %s2358_s28 }
  0x1b   : > { %s1997_s20 = scalar_lea.hbm %s2747_s2, 1024 }
  0x1c   : > { %p1998_p12 = scmp.ne.s32.totalorder %s2747_s2, %s1997_s20  ;;  %p2368_p13 = pneg %p2352_p11 }
  0x1d   : > { %p2004_p5 = scmp.lt.u32.totalorder %s1997_s20, %s2747_s2 }
  0x1e   : > { %p2000_p0 = pnand %p2368_p13, %p1998_p12 }
  0x20   : > { %p2001_p3 = pneg %p2000_p0 }
  0x22   : > { %p2006_p7 = pnand %p2004_p5, %p2001_p3 }
  0x24   : > { %2009 = shalt.err (!%p2006_p7)
}
  0x25   : > { %s2010_s14 = scalar_lea.vmem %s2345_s23, 1024  ;;  %p2018_p2 = scmp.lt.s32.totalorder %s2345_s23, %s2345_s23 }
  0x26   : > { %p2011_p9 = scmp.ne.s32.totalorder %s2345_s23, %s2010_s14  ;;  %p2019_p6 = scmp.lt.s32.totalorder %s2010_s14, %s2010_s14 }
  0x28   : > { %p2013_p10 = pnand %p2011_p9, %p2368_p13  ;;  %p2020_p12 = por %p2019_p6, %p2018_p2 }
  0x2a   : > { %p2014_p1 = pneg %p2013_p10 }
  0x2c   : > { %p2021_p0 = pnand %p2020_p12, %p2014_p1 }
  0x2e   : > { %2024 = shalt.err (!%p2021_p0)
}
  0x2f   : > { %s2218_s29 = smov 128   ;;  %s2219_s20 = smov 8  }
  0x30   : > { %1928 = dma.hbm_to_vmem [thread:$0]  (!%p2352_p11), %s2747_s2, 1024, %s2345_s23, [#allocation8], %s2218_s29, %s2218_s29, %s2219_s20  }
  0x31   : > { %s2025_s14 = scalar_lea.hbm %s2752_s7, 2048 }
  0x32   : > { %p2026_p1 = scmp.ne.s32.totalorder %s2752_s7, %s2025_s14  ;;  %p2032_p10 = scmp.lt.u32.totalorder %s2025_s14, %s2752_s7 }
  0x34   : > { %p2028_p2 = pnand %p2026_p1, %p2368_p13 }
  0x36   : > { %p2029_p6 = pneg %p2028_p2 }
  0x38   : > { %p2034_p3 = pnand %p2032_p10, %p2029_p6 }
  0x3a   : > { %2037 = shalt.err (!%p2034_p3)
}
  0x3b   : > { %s2038_s23 = scalar_lea.vmem %s2356_s26, 2048  ;;  %p2046_p12 = scmp.lt.s32.totalorder %s2356_s26, %s2356_s26 }
  0x3c   : > { %p2039_p5 = scmp.ne.s32.totalorder %s2356_s26, %s2038_s23  ;;  %p2047_p0 = scmp.lt.s32.totalorder %s2038_s23, %s2038_s23 }
  0x3e   : > { %p2041_p7 = pnand %p2039_p5, %p2368_p13  ;;  %p2048_p1 = por %p2047_p0, %p2046_p12 }
  0x40   : > { %p2042_p9 = pneg %p2041_p7 }
  0x42   : > { %p2049_p2 = pnand %p2048_p1, %p2042_p9 }
  0x44   : > { %2052 = shalt.err (!%p2049_p2)
}
  0x45   : > { %1934 = dma.hbm_to_vmem [thread:$0]  (!%p2352_p11), %s2752_s7, 2048, %s2356_s26, [#allocation11], %s2218_s29, %s2218_s29, %s2219_s20  }
  0x46   : > { %s2053_s18 = scalar_lea.hbm %s2748_s3, 1024 }
  0x47   : > { %p2054_p6 = scmp.ne.s32.totalorder %s2748_s3, %s2053_s18  ;;  %p2060_p5 = scmp.lt.u32.totalorder %s2053_s18, %s2748_s3 }
  0x49   : > { %p2056_p10 = pnand %p2054_p6, %p2368_p13 }
  0x4b   : > { %p2057_p3 = pneg %p2056_p10 }
  0x4d   : > { %p2062_p7 = pnand %p2060_p5, %p2057_p3 }
  0x4f   : > { %2065 = shalt.err (!%p2062_p7)
}
  0x50   : > { %s2066_s23 = scalar_lea.vmem %s391_s28, 1024  ;;  %p2074_p1 = scmp.lt.s32.totalorder %s391_s28, %s391_s28 }
  0x51   : > { %p2067_p9 = scmp.ne.s32.totalorder %s391_s28, %s2066_s23  ;;  %p2075_p2 = scmp.lt.s32.totalorder %s2066_s23, %s2066_s23 }
  0x53   : > { %p2069_p12 = pnand %p2067_p9, %p2368_p13  ;;  %p2076_p4 = por %p2075_p2, %p2074_p1 }
  0x55   : > { %p2070_p0 = pneg %p2069_p12 }
  0x57   : > { %p2077_p8 = pnand %p2076_p4, %p2070_p0 }
  0x59   : > { %2080 = shalt.err (!%p2077_p8)
}
  0x5a   : > { %1931 = dma.hbm_to_vmem [thread:$0]  (!%p2352_p11), %s2748_s3, 1024, %s391_s28, [#allocation8], %s2218_s29, %s2218_s29, %s2219_s20  }
  0x5b   : > { %s2220_s9 = smov [#allocation12]   ;;  %s2081_s22 = scalar_lea.hbm %s2753_s8, 2048 }
  0x5c   : > { %s425_s10 = sshll.u32 %s2220_s9, 4  ;;  %p2082_p4 = scmp.ne.s32.totalorder %s2753_s8, %s2081_s22  ;;  %s426_s10 = int_to_ptr.vmem [resolvable:$true] %s425_s10 }
  0x5d   : > { %p2088_p10 = scmp.lt.u32.totalorder %s2081_s22, %s2753_s8 }
  0x5e   : > { %p2084_p8 = pnand %p2082_p4, %p2368_p13 }
  0x60   : > { %p2085_p6 = pneg %p2084_p8 }
  0x62   : > { %p2090_p3 = pnand %p2088_p10, %p2085_p6 }
  0x64   : > { %2093 = shalt.err (!%p2090_p3)
}
  0x65   : > { %s2094_s28 = scalar_lea.vmem %s426_s10, 2048  ;;  %p2102_p12 = scmp.lt.s32.totalorder %s426_s10, %s426_s10 }
  0x66   : > { %p2095_p5 = scmp.ne.s32.totalorder %s426_s10, %s2094_s28  ;;  %p2103_p0 = scmp.lt.s32.totalorder %s2094_s28, %s2094_s28 }
  0x68   : > { %p2097_p7 = pnand %p2095_p5, %p2368_p13  ;;  %p2104_p1 = por %p2103_p0, %p2102_p12 }
  0x6a   : > { %p2098_p9 = pneg %p2097_p7 }
  0x6c   : > { %p2105_p2 = pnand %p2104_p1, %p2098_p9 }
  0x6e   : > { %2108 = shalt.err (!%p2105_p2)
}
  0x6f   : > { %1937 = dma.hbm_to_vmem [thread:$0]  (!%p2352_p11), %s2753_s8, 2048, %s426_s10, [#allocation11], %s2218_s29, %s2218_s29, %s2219_s20  }
  0x70   : > { %s2462_s13 = sadd.s32 1, %s2213_s16   ;;  %s39_s24 = sadd.s32 1, %s2209_s15 }
  0x71   : > { %s36_s9 = ssub.s32 %s2213_s16, %s2462_s13  ;;  %p46_p13 = scmp.ne.s32.totalorder %s2209_s15, %s2205_s30 }
  0x72   : > { %p37_p4 = scmp.eq.s32.totalorder %s36_s9, 0  ;;  %p47_p8 = scmp.eq.s32.totalorder %s2213_s16, 0 }
  0x73   : > { %p2779_p6 = scmp.eq.s32.totalorder %s2322_s17, 1  ;;  %p1950_p3 = scmp.lt.s32.totalorder %s2213_s16, 2 }
  0x74   : > { %s2478_s18 = scalar_select %p37_p4, %s2209_s15, %s39_s24  }
  0x75   : > { %p2472_p10 = por %p2779_p6, %p46_p13  ;;  %p48_p5 = por %p47_p8, %p46_p13 }
  0x76   : > { %s454_s22 = sand.u32 1, %s2209_s15   ;;  %s1420_s10 = sshll.u32 %s2213_s16, 8 }
  0x77   : > { %s1393_s25 = sshll.u32 %s454_s22, 4  ;;  %s2485_s23 = scalar_lea.hbm %s2745_s0, %s1420_s10 }
  0x78   : > { %s458_s28 = scalar_lea.vmem [#allocation4], %s1393_s25  ;;  %p2489_p11 = pnand %p1950_p3, %p48_p5 }
  0x79   : > { %s465_s26 = sshll.u32 %s458_s28, 4  ;;  %s2493_s24 = scalar_lea.sflag [#allocation5], %s454_s22  ;;  %s2487_s26 = int_to_ptr.vmem [resolvable:$true] %s465_s26 }
  0x7a   : > { %s2109_s9 = scalar_lea.hbm %s2485_s23, 256  ;;  %p2111_p9 = pneg %p2489_p11 }
  0x7b   : > { %p2110_p7 = scmp.ne.s32.totalorder %s2485_s23, %s2109_s9  ;;  %s2114_s27 = scalar_lea.hbm %s2745_s0, 512 }
  0x7c   : > { %p2115_p1 = scmp.lt.u32.totalorder %s2485_s23, %s2745_s0  ;;  %p2116_p2 = scmp.lt.u32.totalorder %s2114_s27, %s2109_s9 }
  0x7d   : > { %p2112_p12 = pnand %p2111_p9, %p2110_p7  ;;  %p2118_p4 = scmp.lt.u32.totalorder %s2109_s9, %s2485_s23 }
  0x7e   : > { %p2117_p13 = por %p2116_p2, %p2115_p1 }
  0x7f   : > { %p2113_p0 = pneg %p2112_p12 }
  0x80   : > { %p2119_p8 = por %p2118_p4, %p2117_p13 }
  0x82   : > { %p2120_p6 = pnand %p2119_p8, %p2113_p0 }
  0x84   : > { %2123 = shalt.err (!%p2120_p6)
}
  0x85   : > { %s2124_s22 = scalar_lea.vmem %s2487_s26, 256  ;;  %s2221_s25 = smov [#allocation4]  }
  0x86   : > { %p2125_p3 = scmp.ne.s32.totalorder %s2487_s26, %s2124_s22  ;;  %s2129_s10 = sshll.u32 %s2221_s25, 4  ;;  %s2130_s10 = int_to_ptr.vmem [resolvable:$false] %s2129_s10 }
  0x87   : > { %s2131_s14 = scalar_lea.vmem %s2130_s10, 512  ;;  %p2132_p12 = scmp.lt.s32.totalorder %s2487_s26, %s2130_s10 }
  0x88   : > { %p2127_p5 = pnand %p2125_p3, %p2111_p9  ;;  %p2133_p1 = scmp.lt.s32.totalorder %s2131_s14, %s2124_s22 }
  0x8a   : > { %p2128_p7 = pneg %p2127_p5  ;;  %p2134_p2 = por %p2133_p1, %p2132_p12 }
  0x8c   : > { %p2135_p13 = pnand %p2134_p2, %p2128_p7 }
  0x8e   : > { %2138 = shalt.err (!%p2135_p13)
}
  0x8f   : > { %1941 = dma.hbm_to_vmem [thread:$0]  (!%p2489_p11), %s2485_s23, 256, %s2487_s26, %s2493_s24, %s2218_s29, %s2218_s29, %s2219_s20  }
  0x90   : > { %p2782_p9 = scmp.ne.s32.totalorder %s2776_s21, 0 }
  0x91   : > { %s2527_s9 = sand.u32 (!%p2782_p9), 1, %s2205_s30   ;;  %p2783_p0 = scmp.ne.s32.totalorder (!%p2782_p9), %s2773_s19, 0 }
  0x92   : > { %477 = sbr.rel (%p2782_p9) target bundleno = 946 (0x3b2), region = 76  ;;  %s1397_s27 = sshll.u32 (!%p2782_p9), %s2527_s9, 4 }
  0x93   : > { %s480_s28 = scalar_lea.sflag (!%p2782_p9), [#allocation5], %s2527_s9  ;;  %s483_s5 = scalar_lea.vmem (!%p2782_p9), [#allocation4], %s1397_s27 }
  0x99   : > { %2184 = dma.done.wait (%p2783_p0), %s480_s28, 256  }
  0x9a   : > { %2186 = vsyncadd (%p2783_p0), %s480_s28, 4294967040  ;;  %p2784_p11 = scmp.eq.s32.totalorder %s2322_s17, 0 }
  0x9c   : > { %2188 = dma.done.wait (%p2784_p11), [#allocation8], 2048   ;;  %p2785_p4 = pmov %p2784_p11 }
  0x9e   : > { %2190 = vsyncadd (%p2785_p4), [#allocation8], 4294965248  ;;  %p2786_p8 = pmov %p2785_p4 }
  0x9f   : > { %p2787_p6 = pmov %p2785_p4 }
  0xa0   : > { %2192 = dma.done.wait (%p2786_p8), [#allocation11], 4096  }
  0xa1   : > { %2194 = vsyncadd (%p2787_p6), [#allocation11], 4294963200  ;;  %vm544_vm0 = vcmask 516096   ;;  %v2222_v0 = vmov 0.0   ;;  %v566_v1 = vld [vmem:[#allocation7] sm:$0xff]  ;;  %v567_v2 = vld [vmem:[#allocation7 + $0x8] sm:$0xff] }
  0xa2   : > { %545 = vst.msk [vmem:[#allocation2] sm:$0x1] %vm544_vm0, %v2222_v0  ;;  %546 = vst.msk [vmem:[#allocation2 + $0x11] sm:$0x1] %vm544_vm0, %v2222_v0  ;;  %v568_v3 = vld [vmem:[#allocation7 + $0x10] sm:$0xff]  ;;  %vm551_vm1 = vcmask 523264   ;;  %v1721_v4 = vpack.c.bf16 %v567_v2, %v566_v1 }
  0xa3   : > { %547 = vst [vmem:[#allocation3] sm:$0x1] %v2222_v0  ;;  %548 = vst [vmem:[#allocation3 + $0x11] sm:$0x1] %v2222_v0  ;;  %v569_v5 = vld [vmem:[#allocation7 + $0x18] sm:$0xff]  ;;  %v570_v7 = vld [vmem:[#allocation7 + $0x20] sm:$0xff] }
  0xa4   : > { %v1725_v6 = vpack.c.bf16 %v569_v5, %v568_v3  ;;  %v571_v8 = vld [vmem:[#allocation7 + $0x28] sm:$0xff]  ;;  %v549_v9 = vld [vmem:[%s483_s5] sm:$0xff]  ;;  %1722 = vmatprep.subr.bf16.mxu0 %v1721_v4  ;;  %v573_v13 = vld [vmem:[#allocation7 + $0x38] sm:$0xff]  ;;  %s2788_s19 = sld [smem:[#allocation20_spill]]  ;;  %s2789_s10 = sld [smem:[#allocation21_spill]] }
  0xa5   : > { %552 = vst.msk [vmem:[#allocation2 + $0x1] sm:$0xff] %vm551_vm1, %v549_v9  ;;  %v550_v10 = vld [vmem:[%s483_s5 + $0x8] sm:$0xff]  ;;  %1724 = vmatpush3.bf16.msra.mxu0 %v1721_v4  ;;  %v1729_v11 = vpack.c.bf16 %v571_v8, %v570_v7  ;;  %v572_v12 = vld [vmem:[#allocation7 + $0x30] sm:$0xff]  ;;  %v871_v14 = vld [vmem:[#allocation10] sm:$0xff]  ;;  %s2790_s5 = sld [smem:[#allocation22_spill]]  ;;  %s2791_s29 = sld [smem:[#allocation23_spill]] }
  0xa6   : > { %553 = vst.msk [vmem:[#allocation2 + $0x9] sm:$0xff] %vm551_vm1, %v550_v10  ;;  %1726 = vmatprep.subr.bf16.mxu0 %v1725_v6  ;;  %v1733_v15 = vpack.c.bf16 %v573_v13, %v572_v12  ;;  %v872_v16 = vld [vmem:[#allocation10 + $0x8] sm:$0xff]  ;;  %v873_v17 = vld [vmem:[#allocation10 + $0x10] sm:$0xff]  ;;  %v874_v18 = vld [vmem:[#allocation10 + $0x18] sm:$0xff]  ;;  %s2792_s26 = sld [smem:[#allocation24_spill]]  ;;  %s1421_s24 = sshll.u32 %s2322_s17, 8 }
  0xa7   : > { %v556_v20 = vld [vmem:[%s2746_s1] sm:$0xff]  ;;  %v557_v21 = vld [vmem:[%s2746_s1 + $0x8] sm:$0xff]  ;;  %v1769_v22 = vpack.c.bf16 %v872_v16, %v871_v14  ;;  %v1773_v23 = vpack.c.bf16 %v874_v18, %v873_v17  ;;  %v875_v24 = vld [vmem:[#allocation10 + $0x20] sm:$0xff]  ;;  %s543_s22 = scalar_lea.vmem [#allocation13], %s1397_s27  ;;  %s2793_s28 = sld [smem:[#allocation25_spill]] }
  0xa8   : > { %v876_v25 = vld [vmem:[#allocation10 + $0x28] sm:$0xff]  ;;  %v1737_v26 = vpack.c.bf16 %v557_v21, %v556_v20  ;;  %v558_v27 = vld [vmem:[%s2746_s1 + $0x10] sm:$0xff]  ;;  %v877_v30 = vld [vmem:[#allocation10 + $0x30] sm:$0xff]  ;;  %s1275_s25 = sshll.u32 %s543_s22, 4  ;;  %s1262_s17 = scalar_lea.sflag [#allocation6], %s2527_s9  ;;  %s2699_s25 = int_to_ptr.vmem [resolvable:$true] %s1275_s25 }
  0xa9   : > { %1728 = vmatpush3.bf16.msra.mxu0 %v1725_v6  ;;  %1770 = vmatprep.subr.bf16.mxu1 %v1769_v22  ;;  %v559_v28 = vld [vmem:[%s2746_s1 + $0x18] sm:$0xff]  ;;  %v1777_v29 = vpack.c.bf16 %v876_v25, %v875_v24  ;;  %v878_v31 = vld [vmem:[#allocation10 + $0x38] sm:$0xff]  ;;  %v560_v35 = vld [vmem:[%s2746_s1 + $0x20] sm:$0xff]  ;;  %s2139_s27 = scalar_lea.vmem %s2699_s25, 256 }
  0xaa   : > { %1730 = vmatprep.subr.bf16.mxu0 %v1729_v11  ;;  %1772 = vmatpush3.bf16.msra.mxu1 %v1769_v22  ;;  %v1741_v33 = vpack.c.bf16 %v559_v28, %v558_v27  ;;  %v561_v36 = vld [vmem:[%s2746_s1 + $0x28] sm:$0xff]  ;;  %v1781_v37 = vpack.c.bf16 %v878_v31, %v877_v30  ;;  %v562_v39 = vld [vmem:[%s2746_s1 + $0x30] sm:$0xff]  ;;  %v563_v40 = vld [vmem:[%s2746_s1 + $0x38] sm:$0xff]  ;;  %p2140_p3 = scmp.ne.s32.totalorder %s2699_s25, %s2139_s27 }
  0xab   : > { %1774 = vmatprep.subr.bf16.mxu1 %v1773_v23  ;;  %v1745_v38 = vpack.c.bf16 %v561_v36, %v560_v35  ;;  %v1749_v41 = vpack.c.bf16 %v563_v40, %v562_v39  ;;  %v738_v42 = vld [vmem:[#allocation9] sm:$0xff]  ;;  %v739_v43 = vld [vmem:[#allocation9 + $0x8] sm:$0xff]  ;;  %v740_v45 = vld [vmem:[#allocation9 + $0x10] sm:$0xff] }
  0xac   : > { %v564_v19 = vld [vmem:[#allocation2 + $0x1] sm:$0xff]  ;;  %v1753_v44 = vpack.c.bf16 %v739_v43, %v738_v42  ;;  %v742_v50 = vld [vmem:[#allocation9 + $0x20] sm:$0xff]  ;;  %v743_v51 = vld [vmem:[#allocation9 + $0x28] sm:$0xff]  ;;  %p2141_p5 = pnand %p2140_p3, %p2472_p10 }
  0xad   : > { %1540 = vmatprep.mubr.msk.f32.mxu0 %vm551_vm1, %v564_v19  ;;  %1732 = vmatpush3.bf16.msra.mxu0 %v1729_v11  ;;  %v565_v32 = vld [vmem:[#allocation2 + $0x9] sm:$0xff]  ;;  %v554_v34 = vld [vmem:[#allocation2] sm:$0xff]  ;;  %v1761_v52 = vpack.c.bf16 %v743_v51, %v742_v50  ;;  %v880_v58 = vld [vmem:[#allocation10 + $0x48] sm:$0xff] }
  0xae   : > { %1734 = vmatprep.subr.bf16.mxu0 %v1733_v15  ;;  %1776 = vmatpush3.bf16.msra.mxu1 %v1773_v23  ;;  %v741_v46 = vld [vmem:[#allocation9 + $0x18] sm:$0xff]  ;;  %v744_v53 = vld [vmem:[#allocation9 + $0x30] sm:$0xff]  ;;  %v879_v57 = vld [vmem:[#allocation10 + $0x40] sm:$0xff]  ;;  %p2142_p7 = pneg %p2141_p5 }
  0xaf   : > { %1778 = vmatprep.subr.bf16.mxu1 %v1777_v29  ;;  %v555_v47 = vld [vmem:[#allocation2 + $0x8] sm:$0xff]  ;;  %v1757_v48 = vpack.c.bf16 %v741_v46, %v740_v45  ;;  %v1785_v59 = vpack.c.bf16 %v880_v58, %v879_v57  ;;  %v881_v60 = vld [vmem:[#allocation10 + $0x50] sm:$0xff]  ;;  %v883_v63 = vld [vmem:[#allocation10 + $0x60] sm:$0xff] }
  0xb0   : > { %v736_v49 = vld [vmem:[#allocation2 + $0x2] sm:$0xff]  ;;  %v737_v56 = vld [vmem:[#allocation2 + $0xa] sm:$0xff]  ;;  %v884_v0 = vld [vmem:[#allocation10 + $0x68] sm:$0xff] }
  0xb1   : > { %1736 = vmatpush3.bf16.msra.mxu0 %v1733_v15  ;;  %v745_v54 = vld [vmem:[#allocation9 + $0x38] sm:$0xff]  ;;  %v1793_v1 = vpack.c.bf16 %v884_v0, %v883_v63  ;;  %v885_v2 = vld [vmem:[#allocation10 + $0x70] sm:$0xff]  ;;  %v1152_v10 = vld [vmem:[%s2756_s11 + $0x10] sm:$0xff] }
  0xb2   : > { %1738 = vmatprep.subr.bf16.mxu0 %v1737_v26  ;;  %1780 = vmatpush3.bf16.msra.mxu1 %v1777_v29  ;;  %v1765_v55 = vpack.c.bf16 %v745_v54, %v744_v53  ;;  %v882_v61 = vld [vmem:[#allocation10 + $0x58] sm:$0xff]  ;;  %v853_v5 = vld [vmem:[%s2751_s6] sm:$0xff]  ;;  %v1153_v12 = vld [vmem:[%s2756_s11 + $0x18] sm:$0xff] }
  0xb3   : > { %1782 = vmatprep.subr.bf16.mxu1 %v1781_v37  ;;  %v1789_v62 = vpack.c.bf16 %v882_v61, %v881_v60  ;;  %v886_v3 = vld [vmem:[#allocation10 + $0x78] sm:$0xff]  ;;  %v1150_v8 = vld [vmem:[%s2756_s11] sm:$0xff]  ;;  %v1869_v13 = vpack.c.bf16 %v1153_v12, %v1152_v10  ;;  %v1156_v17 = vld [vmem:[%s2756_s11 + $0x30] sm:$0xff] }
  0xb4   : > { %1541 = vmatmul.mubr.msk.f32.vlgmr.msra.gmra.mrb[0].mxu0 %vm551_vm1, %v565_v32  ;;  %v1797_v4 = vpack.c.bf16 %v886_v3, %v885_v2  ;;  %v854_v6 = vld [vmem:[%s2751_s6 + $0x8] sm:$0xff]  ;;  %v1154_v14 = vld [vmem:[%s2756_s11 + $0x20] sm:$0xff]  ;;  %v1157_v18 = vld [vmem:[%s2756_s11 + $0x38] sm:$0xff] }
  0xb5   : > { %1740 = vmatpush3.bf16.msra.mxu0 %v1737_v26  ;;  %1559 = vmatprep.mubr.msk.f32.mxu0 %vm551_vm1, %v554_v34  ;;  %v1801_v7 = vpack.c.bf16 %v854_v6, %v853_v5  ;;  %v1151_v9 = vld [vmem:[%s2756_s11 + $0x8] sm:$0xff]  ;;  %v1877_v19 = vpack.c.bf16 %v1157_v18, %v1156_v17  ;;  %v1158_v20 = vld [vmem:[%s2756_s11 + $0x40] sm:$0xff]  ;;  %v1160_v23 = vld [vmem:[%s2756_s11 + $0x50] sm:$0xff] }
  0xb6   : > { %1742 = vmatprep.subr.bf16.mxu0 %v1741_v33  ;;  %1784 = vmatpush3.bf16.msra.mxu1 %v1781_v37  ;;  %v1865_v11 = vpack.c.bf16 %v1151_v9, %v1150_v8  ;;  %v1155_v15 = vld [vmem:[%s2756_s11 + $0x28] sm:$0xff]  ;;  %v1161_v24 = vld [vmem:[%s2756_s11 + $0x58] sm:$0xff]  ;;  %v1162_v26 = vld [vmem:[%s2756_s11 + $0x60] sm:$0xff] }
  0xb7   : > { %1786 = vmatprep.subr.bf16.mxu1 %v1785_v59  ;;  %v1873_v16 = vpack.c.bf16 %v1155_v15, %v1154_v14  ;;  %v1159_v21 = vld [vmem:[%s2756_s11 + $0x48] sm:$0xff]  ;;  %v1885_v25 = vpack.c.bf16 %v1161_v24, %v1160_v23  ;;  %v1409_v29 = vld [vmem:[%s2749_s4] ss:$0 sm:$0xff]  ;;  %v855_v37 = vld [vmem:[%s2751_s6 + $0x10] sm:$0xff] }
  0xb8   : > { %v1881_v22 = vpack.c.bf16 %v1159_v21, %v1158_v20  ;;  %v1163_v27 = vld [vmem:[%s2756_s11 + $0x68] sm:$0xff]  ;;  %v1410_v31 = vld [vmem:[%s2788_s19] ss:$0 sm:$0xff]  ;;  %v859_v45 = vld [vmem:[%s2751_s6 + $0x30] sm:$0xff]  ;;  %s2223_s19 = smov [#allocation13]  }
  0xb9   : > { %1744 = vmatpush3.bf16.msra.mxu0 %v1741_v33  ;;  %v1889_v28 = vpack.c.bf16 %v1163_v27, %v1162_v26  ;;  %v857_v42 = vld [vmem:[%s2751_s6 + $0x20] sm:$0xff]  ;;  %v858_v43 = vld [vmem:[%s2751_s6 + $0x28] sm:$0xff]  ;;  %v860_v46 = vld [vmem:[%s2751_s6 + $0x38] sm:$0xff]  ;;  %s2143_s21 = sshll.u32 %s2223_s19, 4  ;;  %s2144_s21 = int_to_ptr.vmem [resolvable:$false] %s2143_s21 }
  0xba   : > { %1746 = vmatprep.subr.bf16.mxu0 %v1745_v38  ;;  %1788 = vmatpush3.bf16.msra.mxu1 %v1785_v59  ;;  %v862_v50 = vld [vmem:[%s2751_s6 + $0x48] sm:$0xff]  ;;  %v864_v53 = vld [vmem:[%s2751_s6 + $0x58] sm:$0xff]  ;;  %v867_v58 = vld [vmem:[%s2751_s6 + $0x70] sm:$0xff]  ;;  %p2146_p12 = scmp.lt.s32.totalorder %s2699_s25, %s2144_s21 }
  0xbb   : > { %1790 = vmatprep.subr.bf16.mxu1 %v1789_v62  ;;  %v868_v59 = vld [vmem:[%s2751_s6 + $0x78] sm:$0xff]  ;;  %v1039_v61 = vld [vmem:[#allocation12] sm:$0xff]  ;;  %v1041_v0 = vld [vmem:[#allocation12 + $0x10] sm:$0xff] }
  0xbc   : > { %v1829_v60 = vpack.c.bf16 %v868_v59, %v867_v58  ;;  %v1044_v5 = vld [vmem:[#allocation12 + $0x28] sm:$0xff]  ;;  %v1045_v8 = vld [vmem:[#allocation12 + $0x30] sm:$0xff]  ;;  %v1046_v9 = vld [vmem:[#allocation12 + $0x38] sm:$0xff] }
  0xbd   : > { %1748 = vmatpush3.bf16.msra.mxu0 %v1745_v38  ;;  %v856_v38 = vld [vmem:[%s2751_s6 + $0x18] sm:$0xff]  ;;  %v1845_v10 = vpack.c.bf16 %v1046_v9, %v1045_v8  ;;  %v1049_v14 = vld [vmem:[#allocation12 + $0x50] sm:$0xff]  ;;  %v1050_v15 = vld [vmem:[#allocation12 + $0x58] sm:$0xff] }
  0xbe   : > { %1750 = vmatprep.subr.bf16.mxu0 %v1749_v41  ;;  %1792 = vmatpush3.bf16.msra.mxu1 %v1789_v62  ;;  %v1040_v62 = vld [vmem:[#allocation12 + $0x8] sm:$0xff]  ;;  %v1051_v17 = vld [vmem:[#allocation12 + $0x60] sm:$0xff]  ;;  %v1053_v20 = vld [vmem:[#allocation12 + $0x70] sm:$0xff] }
  0xbf   : > { %1794 = vmatprep.subr.bf16.mxu1 %v1793_v1  ;;  %v1833_v63 = vpack.c.bf16 %v1040_v62, %v1039_v61  ;;  %v1048_v12 = vld [vmem:[#allocation12 + $0x48] sm:$0xff]  ;;  %v1054_v21 = vld [vmem:[#allocation12 + $0x78] sm:$0xff]  ;;  %v1164_v24 = vld [vmem:[%s2756_s11 + $0x70] sm:$0xff] }
  0xc0   : > { %v1052_v18 = vld [vmem:[#allocation12 + $0x68] sm:$0xff]  ;;  %v1411_v27 = vld [vmem:[%s2789_s10] ss:$0 sm:$0xff] }
  0xc1   : > { %1752 = vmatpush3.bf16.msra.mxu0 %v1749_v41  ;;  %v1805_v41 = vpack.c.bf16 %v856_v38, %v855_v37  ;;  %v1414_v37 = vld [vmem:[%s2792_s26] ss:$0 sm:$0xff] }
  0xc2   : > { %1754 = vmatprep.subr.bf16.mxu0 %v1753_v44  ;;  %1796 = vmatpush3.bf16.msra.mxu1 %v1793_v1  ;;  %v1042_v1 = vld [vmem:[#allocation12 + $0x18] sm:$0xff] }
  0xc3   : > { %1798 = vmatprep.subr.bf16.mxu1 %v1797_v4  ;;  %v1837_v2 = vpack.c.bf16 %v1042_v1, %v1041_v0 }
  0xc4   : > { %1560 = vmatmul.mubr.msk.f32.vlgmr.msra.gmra.mrb[0].mxu0 %vm551_vm1, %v555_v47 }
  0xc5   : > { %1756 = vmatpush3.bf16.msra.mxu0 %v1753_v44  ;;  %1578 = vmatprep.mubr.msk.f32.mxu0 %vm551_vm1, %v736_v49  ;;  %v1809_v44 = vpack.c.bf16 %v858_v43, %v857_v42  ;;  %v861_v49 = vld [vmem:[%s2751_s6 + $0x40] sm:$0xff] }
  0xc6   : > { %1758 = vmatprep.subr.bf16.mxu0 %v1757_v48  ;;  %1800 = vmatpush3.bf16.msra.mxu1 %v1797_v4  ;;  %v1817_v51 = vpack.c.bf16 %v862_v50, %v861_v49  ;;  %v1043_v4 = vld [vmem:[#allocation12 + $0x20] sm:$0xff] }
  0xc7   : > { %1802 = vmatprep.subr.bf16.mxu1 %v1801_v7 }
  0xc9   : > { %1760 = vmatpush3.bf16.msra.mxu0 %v1757_v48  ;;  %v1813_v48 = vpack.c.bf16 %v860_v46, %v859_v45 }
  0xca   : > { %1762 = vmatprep.subr.bf16.mxu0 %v1761_v52 }
  0xcd   : > { %1764 = vmatpush3.bf16.msra.mxu0 %v1761_v52  ;;  %v863_v52 = vld [vmem:[%s2751_s6 + $0x50] sm:$0xff] }
  0xce   : > { %1766 = vmatprep.subr.bf16.mxu0 %v1765_v55  ;;  %v1821_v54 = vpack.c.bf16 %v864_v53, %v863_v52 }
  0xd1   : > { %1768 = vmatpush3.bf16.msra.mxu0 %v1765_v55  ;;  %v865_v55 = vld [vmem:[%s2751_s6 + $0x60] sm:$0xff] }
  0xd2   : > { %1866 = vmatprep.subr.bf16.mxu0 %v1865_v11 }
  0xd4   : > { %1579 = vmatmul.mubr.msk.f32.vlgmr.msra.gmra.mrb[0].mxu0 %vm551_vm1, %v737_v56  ;;  %v866_v56 = vld [vmem:[%s2751_s6 + $0x68] sm:$0xff] }
  0xd5   : > { %1868 = vmatpush3.bf16.msra.mxu0 %v1865_v11  ;;  %v1825_v57 = vpack.c.bf16 %v866_v56, %v865_v55  ;;  %v1047_v11 = vld [vmem:[#allocation12 + $0x40] sm:$0xff] }
  0xd6   : > { %1870 = vmatprep.subr.bf16.mxu0 %v1869_v13 }
  0xd9   : > { %1872 = vmatpush3.bf16.msra.mxu0 %v1869_v13  ;;  %v1849_v13 = vpack.c.bf16 %v1048_v12, %v1047_v11 }
  0xda   : > { %1874 = vmatprep.subr.bf16.mxu0 %v1873_v16 }
  0xdd   : > { %1876 = vmatpush3.bf16.msra.mxu0 %v1873_v16  ;;  %v1853_v16 = vpack.c.bf16 %v1050_v15, %v1049_v14 }
  0xde   : > { %1878 = vmatprep.subr.bf16.mxu0 %v1877_v19 }
  0xe1   : > { %1880 = vmatpush3.bf16.msra.mxu0 %v1877_v19  ;;  %v1857_v19 = vpack.c.bf16 %v1052_v18, %v1051_v17 }
  0xe2   : > { %1882 = vmatprep.subr.bf16.mxu0 %v1881_v22 }
  0xe5   : > { %1884 = vmatpush3.bf16.msra.mxu0 %v1881_v22  ;;  %v1861_v22 = vpack.c.bf16 %v1054_v21, %v1053_v20 }
  0xe6   : > { %1886 = vmatprep.subr.bf16.mxu0 %v1885_v25 }
  0xe9   : > { %1888 = vmatpush3.bf16.msra.mxu0 %v1885_v25  ;;  %v1165_v25 = vld [vmem:[%s2756_s11 + $0x78] sm:$0xff] }
  0xea   : > { %1890 = vmatprep.subr.bf16.mxu0 %v1889_v28  ;;  %v1893_v26 = vpack.c.bf16 %v1165_v25, %v1164_v24 }
  0xed   : > { %1892 = vmatpush3.bf16.msra.mxu0 %v1889_v28 }
  0xee   : > { %1894 = vmatprep.subr.bf16.mxu0 %v1893_v26 }
  0xf1   : > { %1896 = vmatpush3.bf16.msra.mxu0 %v1893_v26 }
 0x1a7   : > { %v1580_v30 = vpop.f32.mrb[0].mxu0 }
 0x1a8   : > { %v837_v32 = vmul.f32 %v1580_v30, %v1409_v29  ;;  %v818_v33 = vpop.f32.mrb[1].mxu0  ;;  %v1412_v30 = vld [vmem:[%s2790_s5] ss:$0 sm:$0xff]  ;;  %s2697_s5 = scalar_lea.hbm %s2793_s28, %s1421_s24 }
 0x1a9   : > { %v836_v34 = vmul.f32 %v1409_v29, %v818_v33 }
 0x1aa   : > { %v846_v35 = vadd.f32 %v1410_v31, %v837_v32 }
 0x1ab   : > { %v845_v36 = vadd.f32 %v1410_v31, %v836_v34 }
 0x1ac   : > { %v848_v39 = vmax.f32 %v846_v35, 0.0  ;;  %v1413_v35 = vld [vmem:[%s2791_s29] ss:$0 sm:$0xff]  ;;  %s2145_s29 = scalar_lea.vmem %s2144_s21, 512 }
 0x1ad   : > { %v847_v40 = vmax.f32 %v845_v36, 0.0  ;;  %p2147_p1 = scmp.lt.s32.totalorder %s2145_s29, %s2139_s27 }
 0x1ae   : > { %850 = vst [vmem:[#allocation3 + $0x9] sm:$0xff] %v848_v39 }
 0x1af   : > { %849 = vst [vmem:[#allocation3 + $0x1] sm:$0xff] %v847_v40  ;;  %1613 = vmatprep.mubr.f32.mxu1 %v847_v40  ;;  %p2148_p2 = por %p2147_p1, %p2146_p12 }
 0x1b0   : > { %1614 = vmatmul.mubr.f32.vlgmr.msra.gmra.mrb[0].mxu1 %v848_v39 }
 0x1b1   : > { %1804 = vmatpush3.bf16.msra.mxu1 %v1801_v7  ;;  %v1841_v7 = vpack.c.bf16 %v1044_v5, %v1043_v4  ;;  %p2149_p13 = pnand %p2148_p2, %p2142_p7 }
 0x1b2   : > { %1806 = vmatprep.subr.bf16.mxu1 %v1805_v41 }
 0x1b5   : > { %1808 = vmatpush3.bf16.msra.mxu1 %v1805_v41  ;;  %v1038_v23 = vld [vmem:[#allocation3 + $0xa] sm:$0xff] }
 0x1b6   : > { %v851_v47 = vld [vmem:[#allocation3] sm:$0xff]  ;;  %1810 = vmatprep.subr.bf16.mxu1 %v1809_v44  ;;  %v852_v3 = vld [vmem:[#allocation3 + $0x8] sm:$0xff] }
 0x1b7   : > { %1648 = vmatprep.mubr.f32.mxu1 %v851_v47  ;;  %v1037_v6 = vld [vmem:[#allocation3 + $0x2] sm:$0xff] }
 0x1b9   : > { %1812 = vmatpush3.bf16.msra.mxu1 %v1809_v44 }
 0x1ba   : > { %1814 = vmatprep.subr.bf16.mxu1 %v1813_v48 }
 0x1bd   : > { %1816 = vmatpush3.bf16.msra.mxu1 %v1813_v48 }
 0x1be   : > { %1818 = vmatprep.subr.bf16.mxu1 %v1817_v51 }
 0x1c1   : > { %1820 = vmatpush3.bf16.msra.mxu1 %v1817_v51 }
 0x1c2   : > { %1822 = vmatprep.subr.bf16.mxu1 %v1821_v54 }
 0x1c5   : > { %1824 = vmatpush3.bf16.msra.mxu1 %v1821_v54 }
 0x1c6   : > { %1826 = vmatprep.subr.bf16.mxu1 %v1825_v57 }
 0x1c9   : > { %1828 = vmatpush3.bf16.msra.mxu1 %v1825_v57 }
 0x1ca   : > { %1830 = vmatprep.subr.bf16.mxu1 %v1829_v60 }
 0x1cd   : > { %1832 = vmatpush3.bf16.msra.mxu1 %v1829_v60 }
 0x1ce   : > { %1834 = vmatprep.subr.bf16.mxu1 %v1833_v63 }
 0x1d0   : > { %1649 = vmatmul.mubr.f32.vlgmr.msra.gmra.mrb[0].mxu1 %v852_v3 }
 0x1d1   : > { %1836 = vmatpush3.bf16.msra.mxu1 %v1833_v63  ;;  %1683 = vmatprep.mubr.f32.mxu1 %v1037_v6 }
 0x1d2   : > { %1838 = vmatprep.subr.bf16.mxu1 %v1837_v2 }
 0x1d5   : > { %1840 = vmatpush3.bf16.msra.mxu1 %v1837_v2 }
 0x1d6   : > { %1842 = vmatprep.subr.bf16.mxu1 %v1841_v7 }
 0x1d9   : > { %1844 = vmatpush3.bf16.msra.mxu1 %v1841_v7 }
 0x1da   : > { %1846 = vmatprep.subr.bf16.mxu1 %v1845_v10 }
 0x1dd   : > { %1848 = vmatpush3.bf16.msra.mxu1 %v1845_v10 }
 0x1de   : > { %1850 = vmatprep.subr.bf16.mxu1 %v1849_v13 }
 0x1e1   : > { %1852 = vmatpush3.bf16.msra.mxu1 %v1849_v13 }
 0x1e2   : > { %1854 = vmatprep.subr.bf16.mxu1 %v1853_v16 }
 0x1e5   : > { %1856 = vmatpush3.bf16.msra.mxu1 %v1853_v16 }
 0x1e6   : > { %1858 = vmatprep.subr.bf16.mxu1 %v1857_v19 }
 0x1e9   : > { %1860 = vmatpush3.bf16.msra.mxu1 %v1857_v19 }
 0x1ea   : > { %1862 = vmatprep.subr.bf16.mxu1 %v1861_v22 }
 0x1ed   : > { %1864 = vmatpush3.bf16.msra.mxu1 %v1861_v22 }
 0x1f0   : > { %1684 = vmatmul.mubr.f32.vlgmr.msra.gmra.mrb[0].mxu1 %v1038_v23 }
 0x2c3   : > { %v1685_v28 = vpop.f32.mrb[0].mxu1 }
 0x2c4   : > { %v1140_v29 = vmul.f32 %v1685_v28, %v1411_v27  ;;  %v1121_v31 = vpop.f32.mrb[1].mxu1 }
 0x2c5   : > { %v1139_v32 = vmul.f32 %v1411_v27, %v1121_v31 }
 0x2c6   : > { %v1149_v34 = vadd.f32 %v1412_v30, %v1140_v29 }
 0x2c7   : > { %v1148_v33 = vadd.f32 %v1412_v30, %v1139_v32 }
 0x2c9   : > { %1718 = vmatprep.mubr.f32.mxu0 %v1148_v33 }
 0x2ca   : > { %1719 = vmatmul.mubr.f32.vlgmr.msra.gmra.mrb[2].mxu0 %v1149_v34 }
 0x39d   : > { %v1720_v36 = vpop.f32.mrb[2].mxu0 }
 0x39e   : > { %v1249_v38 = vmul.f32 %v1720_v36, %v1413_v35  ;;  %v1232_v39 = vpop.f32.mrb[3].mxu0 }
 0x39f   : > { %v1248_v40 = vmul.f32 %v1413_v35, %v1232_v39 }
 0x3a0   : > { %v1258_v41 = vadd.f32 %v1414_v37, %v1249_v38 }
 0x3a1   : > { %v1257_v42 = vadd.f32 %v1414_v37, %v1248_v40 }
 0x3a2   : > { %1260 = vst.msk [vmem:[%s543_s22 + $0x8] sm:$0xff] %vm551_vm1, %v1258_v41 }
 0x3a3   : > { %1259 = vst.msk [vmem:[%s543_s22] sm:$0xff] %vm551_vm1, %v1257_v42 }
 0x3a4   : > { %2152 = shalt.err (!%p2149_p13)
}
 0x3a5   : > { %s2153_s20 = scalar_lea.hbm %s2697_s5, 256  ;;  %s2157_s24 = scalar_lea.hbm %s2793_s28, 512 }
 0x3a6   : > { %p2154_p9 = scmp.ne.s32.totalorder %s2697_s5, %s2153_s20  ;;  %p2158_p4 = scmp.lt.u32.totalorder %s2697_s5, %s2793_s28 }
 0x3a7   : > { %p2159_p8 = scmp.lt.u32.totalorder %s2157_s24, %s2153_s20  ;;  %p2161_p3 = scmp.lt.u32.totalorder %s2153_s20, %s2697_s5 }
 0x3a8   : > { %p2155_p0 = pnand %p2154_p9, %p2472_p10 }
 0x3a9   : > { %p2160_p6 = por %p2159_p8, %p2158_p4 }
 0x3aa   : > { %p2156_p11 = pneg %p2155_p0 }
 0x3ab   : > { %p2162_p5 = por %p2161_p3, %p2160_p6 }
 0x3ad   : > { %p2163_p7 = pnand %p2162_p5, %p2156_p11 }
 0x3af   : > { %2166 = shalt.err (!%p2163_p7)
}
 0x3b0   : > { %s2224_s14 = smov 128   ;;  %s2225_s27 = smov 8  }
 0x3b1   : > { %1923 = dma.vmem_to_hbm [thread:$0]  (%p2472_p10), %s2699_s25, 256, %s2697_s5, %s1262_s17, %s2224_s14, %s2224_s14, %s2225_s27  }
 0x3b2 PF: > { %s2794_s19 = sld [smem:[#allocation18_spill]]  ;;  %s2795_s21 = sld [smem:[#allocation19_spill]] }
 0x3b3   : > { %p2797_p1 = scmp.ge.s32.totalorder %s2213_s16, 2 }
 0x3b8   : > { %s1290_s29 = sand.u32 1, %s2794_s19   ;;  %p2796_p12 = scmp.ne.s32.totalorder %s2795_s21, 0 }
 0x3b9   : > { %s1291_s20 = scalar_lea.sflag [#allocation6], %s1290_s29 }
 0x3ba   : > { %p1943_p2 = pnand %p2797_p1, %p2796_p12 }
 0x3bc   : > { %2196 = dma.done.wait (!%p1943_p2), %s1291_s20, 256  }
 0x3bd   : > { %2198 = vsyncadd (!%p1943_p2), %s1291_s20, 4294967040  ;;  %p29_p13 = scmp.ge.s32.totalorder %s2462_s13, 4   ;;  %s2798_s29 = smov %s2205_s30 }
 0x3be   : > { %s2799_s30 = smov %s2209_s15  ;;  %s2800_s15 = smov %s2478_s18 }
 0x3bf   : > { %s2801_s16 = smov %s2462_s13  ;;  %31 = sbr.rel (!%p29_p13) target bundleno = 14 (0xe), region = 137 }
 0x3c6   :  { %1296 = vsyncpa [#allocation5], 1 }
 0x3c7   :  { %1298 = vsyncpa [#allocation5 + $0x1], 1 }
 0x3c8   :  { %1299 = vsyncpa [#allocation8], 1 }
 0x3c9   :  { %1300 = vsyncpa [#allocation11], 1 }
 0x3ca   :  { %1301 = vsyncpa [#allocation6], 1 }
 0x3cb   :  { %1303 = vsyncpa [#allocation6 + $0x1], 1 }

</bundles_post_ra>
